<compile_context>
chip_gen: v7x
topology: tpu7x:2x2x1
jax: 0.10.0
libtpu: 0.0.40
codegen_flags: <defaults>
</compile_context>

<pallas_src>
import jax
import jax.numpy as jnp
from jax.experimental import pallas as pl
from jax.experimental.pallas import tpu as pltpu

_LANE = 128
_SMALL_BYTES = 1 << 20          # below this: no kernel at all (pure param read)
_SINGLE_BLOCK_BYTES = 2 << 20   # below this: one full-array block, no grid
_TARGET_TILE_BYTES = 1 << 20    # ~1 MiB tiles -> 4 pipelined buffers ~= 4 MiB VMEM


def _copy_kernel(xu_ref, out_ref):
    # forward() == identity on the parameter; whole tile resident in VMEM.
    out_ref[...] = xu_ref[...]


def _sublane(dtype) -> int:
    """Native sublane packing quantum: 8 rows for 32-bit, 16 for 16-bit, 32 for 8-bit."""
    return max(8, 32 // jnp.dtype(dtype).itemsize)


def _pick_tile_rows(rows: int, itemsize: int, sublane: int) -> int:
    """Byte-aware row tile: ~1 MiB per tile, multiple of the sublane quantum,
    with a preference for an even grid step count (v7x megacore split)."""
    target = max(sublane, _TARGET_TILE_BYTES // (_LANE * itemsize))
    tile = max(sublane, (target // sublane) * sublane)
    tile = min(tile, ((rows + sublane - 1) // sublane) * sublane)
    steps = pl.cdiv(rows, tile)
    if steps > 1 and steps % 2 == 1:
        steps += 1
        tile = ((pl.cdiv(rows, steps) + sublane - 1) // sublane) * sublane
    return tile


def inducing_points_forward(xu: jax.Array, *, force_pallas: bool = False) -> jax.Array:
    """Pallas/JAX implementation of InducingPoints.forward(): returns Xu."""
    # Optimal path: forward() is a pure parameter read -> no kernel, no HBM traffic.
    if not force_pallas and xu.nbytes < _SMALL_BYTES:
        return xu

    orig_shape = xu.shape
    total = int(xu.size)
    if total == 0:
        return xu

    itemsize = jnp.dtype(xu.dtype).itemsize
    sublane = _sublane(xu.dtype)

    # Lane-dense view: last dim == 128 so the write path is unmasked full-lane vst.
    pad = 0
    if total % _LANE == 0:
        flat = xu.reshape(total // _LANE, _LANE)
    else:
        quantum = sublane * _LANE
        padded = ((total + quantum - 1) // quantum) * quantum
        pad = padded - total
        flat = jnp.pad(xu.reshape(-1), (0, pad)).reshape(padded // _LANE, _LANE)
    rows, cols = flat.shape

    total_bytes = rows * cols * itemsize
    if total_bytes <= _SINGLE_BLOCK_BYTES:
        # Small enough: single full-array block (legal for any row count),
        # no grid bookkeeping, no aliasing of the held parameter buffer.
        out = pl.pallas_call(
            _copy_kernel,
            out_shape=jax.ShapeDtypeStruct((rows, cols), flat.dtype),
        )(flat)
    else:
        # Large Xu: row-tiled, auto-pipelined copy.  ~1 MiB tiles keep the
        # double-buffered in+out footprint (~4 MiB) well under scoped VMEM on
        # all generations; "parallel" lets v7x's two TensorCores split the grid.
        tile_rows = _pick_tile_rows(rows, itemsize, sublane)
        out = pl.pallas_call(
            _copy_kernel,
            out_shape=jax.ShapeDtypeStruct((rows, cols), flat.dtype),
            grid=(pl.cdiv(rows, tile_rows),),
            in_specs=[pl.BlockSpec((tile_rows, cols), lambda i: (i, 0))],
            out_specs=pl.BlockSpec((tile_rows, cols), lambda i: (i, 0)),
            compiler_params=pltpu.CompilerParams(
                dimension_semantics=("parallel",),
            ),
        )(flat)

    if pad:
        out = out.reshape(-1)[:total]
    return out.reshape(orig_shape)


class InducingPoints:
    """JAX/Pallas analogue of the PyTorch module (holds the parameter Xu)."""
    # TODO(synk): nn.Parameter registration / autograd bookkeeping has no Pallas
    # equivalent; Xu is stored as a plain jax.Array attribute.

    def __init__(self, Xu: jax.Array, name: str = "inducing_points"):
        self.inducing_points = Xu
        self.name = name

    def __call__(self) -> jax.Array:
        return inducing_points_forward(self.inducing_points)


if __name__ == "__main__":
    # Deterministic parameter init: Xu with shape (num_inducing=16, dim=32).
    key = jax.random.PRNGKey(0)
    Xu = jax.random.normal(key, (16, 32), dtype=jnp.float32)

    # Default module call: zero-kernel path (pure parameter read).
    module = InducingPoints(Xu)
    out = jax.block_until_ready(module())
    assert out.shape == Xu.shape and out.dtype == Xu.dtype
    assert bool(jnp.allclose(out, Xu))

    # Force the Pallas path on the small Xu (lane-dense single-block copy).
    out_p = jax.block_until_ready(inducing_points_forward(Xu, force_pallas=True))
    assert out_p.shape == Xu.shape and out_p.dtype == Xu.dtype
    assert bool(jnp.array_equal(out_p, Xu))

    # Tiled, auto-pipelined, megacore-parallel path (flat view 8192 x 128, 4 tiles).
    Xu_big = jax.random.normal(jax.random.PRNGKey(1), (4096, 256), dtype=jnp.float32)
    out_big = jax.block_until_ready(inducing_points_forward(Xu_big, force_pallas=True))
    assert out_big.shape == Xu_big.shape and out_big.dtype == Xu_big.dtype
    assert bool(jnp.array_equal(out_big, Xu_big))

    # Non-multiple-of-128 total size: pad/slice lane-dense path.
    Xu_odd = jax.random.normal(jax.random.PRNGKey(2), (33, 7), dtype=jnp.float32)
    out_odd = jax.block_until_ready(inducing_points_forward(Xu_odd, force_pallas=True))
    assert out_odd.shape == Xu_odd.shape and bool(jnp.array_equal(out_odd, Xu_odd))

    print("KERNEL_OK")
</pallas_src>

<mosaic_0001>
module attributes {stable_mosaic.version = 11 : i64} {
  func.func @_copy_kernel(%arg0: memref<4x128xf32, #tpu.memory_space<vmem>>, %arg1: memref<4x128xf32, #tpu.memory_space<vmem>>) attributes {dimension_semantics = [], scalar_prefetch = 0 : i64, scratch_operands = 0 : i64, tpu.core_type = #tpu.core_type<tc>} {
    %c0 = arith.constant 0 : index
    %c0_0 = arith.constant 0 : index
    %0 = vector.load %arg0[%c0, %c0_0] : memref<4x128xf32, #tpu.memory_space<vmem>>, vector<4x128xf32>
    %c0_1 = arith.constant 0 : index
    %c0_2 = arith.constant 0 : index
    %1 = vector.load %arg1[%c0_1, %c0_2] : memref<4x128xf32, #tpu.memory_space<vmem>>, vector<4x128xf32>
    tpu.vector_store %arg1[%c0_1, %c0_2], %0 {strides = array<i32>} : memref<4x128xf32, #tpu.memory_space<vmem>>, vector<4x128xf32>,
    return
  }
}

</mosaic_0001>

<bundles_post_ra>
// kernel: tpu_custom_call.1
= control target key start
LH: loop header
LB: loop body
LE: loop exit
PB: predicated region body
PF: predicated region fallthrough
CT: control target
= control target key end

     0   :  { %6 = vsyncpa [#allocation3], 0  ;;  %s124_s0 = inlined_call_operand.hbm [shape: f32[4,128], index: 0, kind: input, shape index: {}]   ;;  %s125_s1 = inlined_call_operand.hbm [shape: f32[4,128], index: 1, kind: output, shape index: {}]  }
   0x1   :  { %7 = vsyncpa [#allocation4], 0  ;;  %s88_s6 = smov [#allocation2]   ;;  %s40_s10 = scalar_lea.hbm %s124_s0, 64 }
   0x2   :  { %s14_s7 = sshll.u32 %s88_s6, 4  ;;  %p41_p0 = scmp.ne.s32.totalorder %s124_s0, %s40_s10  ;;  %s15_s7 = int_to_ptr.vmem [resolvable:$true] %s14_s7 }
   0x3   :  { %p44_p1 = scmp.lt.u32.totalorder %s40_s10, %s124_s0 }
   0x5   :  { %p46_p2 = pnand %p44_p1, %p41_p0 }
   0x7   :  { %49 = shalt.err (!%p46_p2)
}
   0x8   :  { %s50_s15 = scalar_lea.vmem %s15_s7, 64  ;;  %p55_p4 = scmp.lt.s32.totalorder %s15_s7, %s15_s7 }
   0x9   :  { %p51_p3 = scmp.ne.s32.totalorder %s15_s7, %s50_s15  ;;  %p56_p5 = scmp.lt.s32.totalorder %s50_s15, %s50_s15 }
   0xb   :  { %p57_p6 = por %p56_p5, %p55_p4 }
   0xd   :  { %p58_p7 = pnand %p57_p6, %p51_p3 }
   0xf   :  { %61 = shalt.err (!%p58_p7)
}
  0x10   :  { %17 = dma.hbm_to_vmem [thread:$0]  %s124_s0, 64, %s15_s7, [#allocation3]  }
  0x11   :  { %84 = dma.done.wait [#allocation3], 64  }
  0x12   :  { %85 = vsyncadd [#allocation3], 4294967232  ;;  %s89_s18 = smov [#allocation5]   ;;  %v21_v0 = vld [vmem:[#allocation2] sm:$0xf] }
  0x13   :  { %s29_s19 = sshll.u32 %s89_s18, 4  ;;  %22 = vst [vmem:[#allocation5] sm:$0xf] %v21_v0  ;;  %s30_s19 = int_to_ptr.vmem [resolvable:$true] %s29_s19 }
  0x14   :  { %s62_s20 = scalar_lea.vmem %s30_s19, 64  ;;  %p67_p9 = scmp.lt.s32.totalorder %s30_s19, %s30_s19 }
  0x15   :  { %p63_p8 = scmp.ne.s32.totalorder %s30_s19, %s62_s20  ;;  %p68_p10 = scmp.lt.s32.totalorder %s62_s20, %s62_s20 }
  0x17   :  { %p69_p11 = por %p68_p10, %p67_p9 }
  0x19   :  { %p70_p12 = pnand %p69_p11, %p63_p8 }
  0x1b   :  { %73 = shalt.err (!%p70_p12)
}
  0x1c   :  { %s74_s23 = scalar_lea.hbm %s125_s1, 64 }
  0x1d   :  { %p75_p13 = scmp.ne.s32.totalorder %s125_s1, %s74_s23  ;;  %p78_p0 = scmp.lt.u32.totalorder %s74_s23, %s125_s1 }
  0x1f   :  { %p80_p1 = pnand %p78_p0, %p75_p13 }
  0x21   :  { %83 = shalt.err (!%p80_p1)
}
  0x22   :  { %32 = dma.vmem_to_hbm [thread:$0]  %s30_s19, 64, %s125_s1, [#allocation4]  }
  0x23   :  { %86 = dma.done.wait [#allocation4], 64  }
  0x24   :  { %87 = vsyncadd [#allocation4], 4294967232 }
  0x25   :  { %36 = vsyncpa [#allocation3], 1 }
  0x26   :  { %37 = vsyncpa [#allocation4], 1 }

</bundles_post_ra>
